<compile_context>
chip_gen: v7x
topology: tpu7x:2x2x1
jax: 0.10.0
libtpu: 0.0.40
codegen_flags: <defaults>
</compile_context>

<pallas_src>
import jax
import jax.numpy as jnp
from jax import lax
from jax.experimental import pallas as pl
from jax.experimental.pallas import tpu as pltpu


MAX_SEQ = 128  # fixed in the PyTorch module


def _round_up(x, m):
    return ((x + m - 1) // m) * m


def _num_tensorcores():
    # v7x has 2 TensorCores per chip; v5e/v6e have 1.
    try:
        kind = jax.devices()[0].device_kind.lower()
        return 2 if "v7" in kind else 1
    except Exception:
        return 1


def _choose_tm(mp, n_cores):
    # mp is a multiple of 128.  Cap tm at 512 to bound the per-step one-hot
    # transient and the double-buffered output tile in VMEM.
    if n_cores <= 1:
        # Single TensorCore (v5e/v6e): one big lane-dense tile; each extra
        # grid step only adds ~0.35us overhead on a us-scale kernel.
        for tm in (512, 256, 128):
            if mp % tm == 0:
                return tm
        return 128
    # v7x (2 TCs): prefer >= 4 parallel steps so each core overlaps its
    # output writeback with the next step; accept 2 as the floor.
    for min_steps in (4, 2):
        for tm in (512, 256, 128):
            if mp % tm == 0 and mp // tm >= min_steps:
                return tm
    return 128


# ----------------------------------------------------------------------------
# Pallas kernel: fused-table row lookup via lane-dense one-hot MXU matmul.
#   out[r, :] = fused_table[ids[r], :]
# (bias already folded into every table row; padding slots were remapped to a
#  bias-only row in the wrapper, so they produce exactly Linear(0) == bias).
# ----------------------------------------------------------------------------
def _emoji_lookup_kernel(ids_ref, ftab_ref, o_ref):
    # ids_ref : (tm, 1)   int32   row index into the fused table
    # ftab_ref: (Vp, Np)  float32 (E @ W + b rows, plus bias row), VMEM-resident
    # o_ref   : (tm, Np)  float32
    tm = ids_ref.shape[0]
    vp, npad = ftab_ref.shape
    ids = ids_ref[...]                                        # (tm, 1)
    chunk = 128
    n_chunks = vp // chunk

    if n_chunks == 1:
        # Small vocab: one lane-dense (tm, 128) one-hot slice, one MXU matmul.
        lanes = lax.broadcasted_iota(jnp.int32, (tm, vp), 1)
        one_hot = (ids == lanes).astype(jnp.float32)
        o_ref[...] = jnp.dot(
            one_hot, ftab_ref[...],
            preferred_element_type=jnp.float32).astype(o_ref.dtype)
    else:
        # Large vocab: chunk the contraction so only a (tm, 128) one-hot slice
        # is live per iteration (bounds transients regardless of vocab size).
        # TODO(synk): for very large vocabularies an in-kernel XLU gather
        # would avoid the O(tm*Vp*Np) MXU work entirely.
        def body(c, acc):
            base = pl.multiple_of(c * chunk, chunk)
            lanes = base + lax.broadcasted_iota(jnp.int32, (tm, chunk), 1)
            one_hot = (ids == lanes).astype(jnp.float32)
            return acc + jnp.dot(one_hot, ftab_ref[pl.ds(base, chunk), :],
                                 preferred_element_type=jnp.float32)

        acc = lax.fori_loop(0, n_chunks, body,
                            jnp.zeros((tm, npad), jnp.float32))
        o_ref[...] = acc.astype(o_ref.dtype)


# ----------------------------------------------------------------------------
# Weight-dependent prep (run ONCE for static weights, outside the hot path).
# ----------------------------------------------------------------------------
def prepare_fused_table(emoji_table, proj_w, proj_b):
    """Build padded fused lookup table.

    Row r < vocab:  emoji_table[r] @ W + b   (== Linear(emoji2vec[r]))
    Row vocab:      b                        (== Linear(0), the padding slot)
    Remaining rows (vocab padding to a multiple of 128) are zero and unused.
    """
    vocab = emoji_table.shape[0]
    out_dim = proj_w.shape[1]
    fused = jnp.dot(emoji_table.astype(jnp.float32), proj_w.astype(jnp.float32),
                    preferred_element_type=jnp.float32) + proj_b[None, :]
    table = jnp.concatenate(
        [fused, proj_b[None, :].astype(jnp.float32)], axis=0)      # (vocab+1, N)
    vp = _round_up(vocab + 1, 128)
    npad = _round_up(out_dim, 128)
    table = jnp.pad(table, ((0, vp - (vocab + 1)), (0, npad - out_dim)))
    return table, vocab, out_dim


# ----------------------------------------------------------------------------
# Hot path: ids -> (B, MAX_SEQ, emoji_dim) via the Pallas kernel.
# ----------------------------------------------------------------------------
def emoji_encoder_apply(emoji_ids, fused_table, vocab, out_dim):
    """
    emoji_ids:   (B, MAX_SEQ) int32, -1 == padding (no emoji at that slot).
    fused_table: (Vp, Np) float32 from prepare_fused_table.
    returns:     (B, MAX_SEQ, out_dim) float32
    """
    # TODO(synk): the original module parses Python strings against the
    # emoji2vec vocabulary; that host-side string processing has no Pallas
    # equivalent, so the lookup is driven by integer ids with -1 padding.
    B, S = emoji_ids.shape
    vp, npad = fused_table.shape
    M = B * S
    mp = _round_up(M, 128)
    tm = _choose_tm(mp, _num_tensorcores())

    # Remap "no emoji" (-1) to the bias-only row; flatten and pad the rows.
    ids = jnp.where(emoji_ids >= 0, emoji_ids, vocab).astype(jnp.int32)
    ids2d = ids.reshape(M, 1)
    if mp != M:
        ids2d = jnp.pad(ids2d, ((0, mp - M), (0, 0)), constant_values=vocab)

    cost = pl.CostEstimate(
        flops=2 * mp * vp * npad,
        bytes_accessed=mp * 4 + vp * npad * 4 + mp * npad * 4,
        transcendentals=0,
    )

    def run(single_buffer_table):
        table_kwargs = (
            dict(pipeline_mode=pl.Buffered(1)) if single_buffer_table else {})
        return pl.pallas_call(
            _emoji_lookup_kernel,
            out_shape=jax.ShapeDtypeStruct((mp, npad), jnp.float32),
            grid_spec=pltpu.PrefetchScalarGridSpec(
                num_scalar_prefetch=0,
                grid=(mp // tm,),
                in_specs=[
                    # tiny per-step ids block
                    pl.BlockSpec((tm, 1), lambda i: (i, 0)),
                    # grid-invariant fused table, VMEM-resident
                    pl.BlockSpec((vp, npad), lambda i: (0, 0), **table_kwargs),
                ],
                out_specs=pl.BlockSpec((tm, npad), lambda i: (i, 0)),
            ),
            compiler_params=pltpu.CompilerParams(
                dimension_semantics=("parallel",)),
            cost_estimate=cost,
        )(ids2d, fused_table)

    try:
        out = run(True)
    except Exception:
        # pipeline_mode / Buffered(1) unavailable in this jax build: fall back
        # to default double-buffering of the (grid-invariant) table.
        out = run(False)

    return out[:M, :out_dim].reshape(B, S, out_dim)


def emoji_encoder_forward(emoji_ids, emoji_table, proj_w, proj_b):
    """Convenience one-shot forward (prep + apply)."""
    fused_table, vocab, out_dim = prepare_fused_table(emoji_table, proj_w, proj_b)
    return emoji_encoder_apply(emoji_ids, fused_table, vocab, out_dim)


# ----------------------------------------------------------------------------
# Demo / self-test
# ----------------------------------------------------------------------------
if __name__ == "__main__":
    key = jax.random.PRNGKey(0)
    k_tab, k_w, k_b, k_ids, k_len = jax.random.split(key, 5)

    # Small deterministic synthetic sizes (simulated emoji2vec vector_size=64,
    # emoji_dim=128, batch=2, fixed seq_len=128 from the module).
    batch = 2
    vocab = 32
    vector_size = 64
    emoji_dim = 128

    emoji_table = jax.random.normal(k_tab, (vocab, vector_size), jnp.float32)
    proj_w = (jax.random.normal(k_w, (vector_size, emoji_dim), jnp.float32)
              * (1.0 / jnp.sqrt(vector_size)))
    proj_b = jax.random.normal(k_b, (emoji_dim,), jnp.float32) * 0.01

    # Simulated "emojis found in each text": a few per example, -1 padding.
    emoji_ids = jax.random.randint(k_ids, (batch, MAX_SEQ), 0, vocab, jnp.int32)
    lengths = jax.random.randint(k_len, (batch,), 3, 20, jnp.int32)
    pos = jnp.arange(MAX_SEQ)[None, :]
    emoji_ids = jnp.where(pos < lengths[:, None], emoji_ids, -1)

    # Weight-dependent prep is hoisted out of the per-call hot path.
    fused_table, vocab_sz, out_dim = prepare_fused_table(
        emoji_table, proj_w, proj_b)
    out = emoji_encoder_apply(emoji_ids, fused_table, vocab_sz, out_dim)
    out = jax.block_until_ready(out)

    # Pure-JAX reference (mirrors the PyTorch module: zero-padded embeddings
    # -> Linear; padded slots produce exactly the bias).
    safe = jnp.maximum(emoji_ids, 0)
    emb = emoji_table[safe] * (emoji_ids >= 0)[..., None].astype(jnp.float32)
    ref = emb @ proj_w + proj_b

    assert out.shape == (batch, MAX_SEQ, emoji_dim)
    err = float(jnp.max(jnp.abs(out - ref)))
    assert jnp.allclose(out, ref, atol=1e-4, rtol=1e-4), err

    print("KERNEL_OK")
</pallas_src>

<mosaic_0001>
module attributes {stable_mosaic.version = 11 : i64} {
  func.func @_emoji_lookup_kernel(%arg0: i32, %arg1: memref<256x1xi32, #tpu.memory_space<vmem>>, %arg2: memref<128x128xf32, #tpu.memory_space<vmem>>, %arg3: memref<256x128xf32, #tpu.memory_space<vmem>>) attributes {dimension_semantics = [#tpu.dimension_semantics<parallel>], iteration_bounds = array<i64: 1>, scalar_prefetch = 0 : i64, scratch_operands = 0 : i64, tpu.core_type = #tpu.core_type<tc>, window_params = [{transform_indices = @transform_0, window_bounds = array<i64: 256, 1>}, {pipeline_mode = #tpu.pipeline_mode<synchronous>, transform_indices = @transform_1, window_bounds = array<i64: 128, 128>}, {transform_indices = @transform_2, window_bounds = array<i64: 256, 128>}]} {
    %c0 = arith.constant 0 : index
    %c0_0 = arith.constant 0 : index
    %0 = vector.load %arg1[%c0, %c0_0] : memref<256x1xi32, #tpu.memory_space<vmem>>, vector<256x1xi32>
    %1 = tpu.iota {dimensions = array<i32: 1>} : vector<256x128xi32>
    %2 = vector.broadcast %0 : vector<256x1xi32> to vector<256x128xi32>
    %3 = arith.cmpi eq, %2, %1 : vector<256x128xi32>
    %4 = arith.extui %3 : vector<256x128xi1> to vector<256x128xi32>
    %5 = arith.sitofp %4 : vector<256x128xi32> to vector<256x128xf32>
    %c0_1 = arith.constant 0 : index
    %c0_2 = arith.constant 0 : index
    %6 = vector.load %arg2[%c0_1, %c0_2] : memref<128x128xf32, #tpu.memory_space<vmem>>, vector<128x128xf32>
    %cst = arith.constant dense<0.000000e+00> : vector<256x128xf32>
    %7 = tpu.matmul %5, %6, %cst {dimension_numbers = #tpu.dot_dimension_numbers<[1], [0], [0], [1], [0, 0, 1, 1], [], []>} : vector<256x128xf32>, vector<128x128xf32>, vector<256x128xf32> -> vector<256x128xf32>
    %c0_3 = arith.constant 0 : index
    %c0_4 = arith.constant 0 : index
    %8 = vector.load %arg3[%c0_3, %c0_4] : memref<256x128xf32, #tpu.memory_space<vmem>>, vector<256x128xf32>
    tpu.vector_store %arg3[%c0_3, %c0_4], %7 {strides = array<i32>} : memref<256x128xf32, #tpu.memory_space<vmem>>, vector<256x128xf32>,
    return
  }
  func.func @transform_0(%arg0: i32) -> (i32, i32) {
    %c0_i32 = arith.constant 0 : i32
    %c0_i32_0 = arith.constant 0 : i32
    return %arg0, %c0_i32 : i32, i32
  }
  func.func @transform_1(%arg0: i32) -> (i32, i32) {
    %c0_i32 = arith.constant 0 : i32
    %c0_i32_0 = arith.constant 0 : i32
    %c0_i32_1 = arith.constant 0 : i32
    return %c0_i32, %c0_i32_0 : i32, i32
  }
  func.func @transform_2(%arg0: i32) -> (i32, i32) {
    %c0_i32 = arith.constant 0 : i32
    %c0_i32_0 = arith.constant 0 : i32
    return %arg0, %c0_i32 : i32, i32
  }
}

module attributes {stable_mosaic.version = 11 : i64} {
  func.func @_emoji_lookup_kernel(%arg0: i32, %arg1: memref<256x1xi32, #tpu.memory_space<vmem>>, %arg2: memref<128x128xf32, #tpu.memory_space<vmem>>, %arg3: memref<256x128xf32, #tpu.memory_space<vmem>>) attributes {dimension_semantics = [#tpu.dimension_semantics<parallel>], iteration_bounds = array<i64: 1>, scalar_prefetch = 0 : i64, scratch_operands = 0 : i64, tpu.core_type = #tpu.core_type<tc>, window_params = [{transform_indices = @transform_0, window_bounds = array<i64: 256, 1>}, {pipeline_mode = #tpu.pipeline_mode<synchronous>, transform_indices = @transform_1, window_bounds = array<i64: 128, 128>}, {transform_indices = @transform_2, window_bounds = array<i64: 256, 128>}]} {
    %c0 = arith.constant 0 : index
    %c0_0 = arith.constant 0 : index
    %0 = vector.load %arg1[%c0, %c0_0] : memref<256x1xi32, #tpu.memory_space<vmem>>, vector<256x1xi32>
    %1 = tpu.iota {dimensions = array<i32: 1>} : vector<256x128xi32>
    %2 = vector.broadcast %0 : vector<256x1xi32> to vector<256x128xi32>
    %3 = arith.cmpi eq, %2, %1 : vector<256x128xi32>
    %4 = arith.extui %3 : vector<256x128xi1> to vector<256x128xi32>
    %5 = arith.sitofp %4 : vector<256x128xi32> to vector<256x128xf32>
    %c0_1 = arith.constant 0 : index
    %c0_2 = arith.constant 0 : index
    %6 = vector.load %arg2[%c0_1, %c0_2] : memref<128x128xf32, #tpu.memory_space<vmem>>, vector<128x128xf32>
    %cst = arith.constant dense<0.000000e+00> : vector<256x128xf32>
    %7 = tpu.matmul %5, %6, %cst {dimension_numbers = #tpu.dot_dimension_numbers<[1], [0], [0], [1], [0, 0, 1, 1], [], []>} : vector<256x128xf32>, vector<128x128xf32>, vector<256x128xf32> -> vector<256x128xf32>
    %c0_3 = arith.constant 0 : index
    %c0_4 = arith.constant 0 : index
    %8 = vector.load %arg3[%c0_3, %c0_4] : memref<256x128xf32, #tpu.memory_space<vmem>>, vector<256x128xf32>
    tpu.vector_store %arg3[%c0_3, %c0_4], %7 {strides = array<i32>} : memref<256x128xf32, #tpu.memory_space<vmem>>, vector<256x128xf32>,
    return
  }
  func.func @transform_0(%arg0: i32) -> (i32, i32) {
    %c0_i32 = arith.constant 0 : i32
    %c0_i32_0 = arith.constant 0 : i32
    return %arg0, %c0_i32 : i32, i32
  }
  func.func @transform_1(%arg0: i32) -> (i32, i32) {
    %c0_i32 = arith.constant 0 : i32
    %c0_i32_0 = arith.constant 0 : i32
    %c0_i32_1 = arith.constant 0 : i32
    return %c0_i32, %c0_i32_0 : i32, i32
  }
  func.func @transform_2(%arg0: i32) -> (i32, i32) {
    %c0_i32 = arith.constant 0 : i32
    %c0_i32_0 = arith.constant 0 : i32
    return %arg0, %c0_i32 : i32, i32
  }
}

</mosaic_0001>

<bundles_post_ra>
// kernel: tpu_custom_call.1
= control target key start
LH: loop header
LB: loop body
LE: loop exit
PB: predicated region body
PF: predicated region fallthrough
CT: control target
= control target key end

     0   :  { %v798_v2 = vmov 0   ;;  %s1040_s0 = inlined_call_operand.vmem [shape: s32[256,1], index: 0, kind: input, shape index: {}]   ;;  %s1041_s1 = inlined_call_operand.vmem [shape: f32[128,128], index: 1, kind: input, shape index: {}]   ;;  %s1042_s2 = inlined_call_operand.hbm [shape: f32[256,128], index: 2, kind: output, shape index: {}]  }
   0x1   :  { %v13_v0 = vld [vmem:[%s1040_s0 + $0x8] sm:$0xff]  ;;  %v12_v1 = vld [vmem:[%s1040_s0] sm:$0xff]  ;;  %773 = vset.pattern.permute.xlu1 %v798_v2  ;;  %772 = vset.pattern.permute.xlu0 %v798_v2  ;;  %v30_v5 = vld [vmem:[%s1040_s0 + $0x90] sm:$0xff] }
   0x2   :  { %50 = vperm.xlu1 %773, %v13_v0   ;;  %47 = vperm.xlu0 %772, %v12_v1   ;;  %v29_v3 = vld [vmem:[%s1040_s0 + $0x88] sm:$0xff]  ;;  %v28_v4 = vld [vmem:[%s1040_s0 + $0x80] sm:$0xff]  ;;  %v14_v6 = vld [vmem:[%s1040_s0 + $0x10] sm:$0xff] }
   0x3   :  { %v31_v7 = vld [vmem:[%s1040_s0 + $0x98] sm:$0xff]  ;;  %v238_v9 = vld [vmem:[%s1041_s1] sm:$0xff]  ;;  %v239_v10 = vld [vmem:[%s1041_s1 + $0x8] sm:$0xff] }
   0x4   :  { %v15_v8 = vld [vmem:[%s1040_s0 + $0x18] sm:$0xff]  ;;  %v240_v11 = vld [vmem:[%s1041_s1 + $0x10] sm:$0xff]  ;;  %v719_v13 = vpack.c.bf16 %v239_v10, %v238_v9  ;;  %v242_v15 = vld [vmem:[%s1041_s1 + $0x20] sm:$0xff] }
   0x5   :  { %v241_v12 = vld [vmem:[%s1041_s1 + $0x18] sm:$0xff]  ;;  %v243_v16 = vld [vmem:[%s1041_s1 + $0x28] sm:$0xff]  ;;  %v32_v17 = vld [vmem:[%s1040_s0 + $0xa0] sm:$0xff] }
   0x6   :  { %98 = vperm.xlu1 %773, %v29_v3   ;;  %95 = vperm.xlu0 %772, %v28_v4   ;;  %v723_v14 = vpack.c.bf16 %v241_v12, %v240_v11  ;;  %v16_v18 = vld [vmem:[%s1040_s0 + $0x20] sm:$0xff] }
   0x7   :  { %720 = vmatprep.subr.bf16.mxu0 %v719_v13  ;;  %751 = vmatprep.subr.bf16.mxu1 %v719_v13 }
   0x8   :  { %722 = vmatpush3.bf16.msra.mxu0 %v719_v13  ;;  %759 = vmatpush3.bf16.msra.mxu1 %v719_v13 }
   0xa   :  { %101 = vperm.xlu1 %773, %v30_v5   ;;  %53 = vperm.xlu0 %772, %v14_v6  }
   0xe   :  { %104 = vperm.xlu1 %773, %v31_v7   ;;  %56 = vperm.xlu0 %772, %v15_v8  }
   0xf   :  { %7 = vsyncpa [#allocation3], 0  ;;  %724 = vmatprep.subr.bf16.mxu0 %v723_v14  ;;  %752 = vmatprep.subr.bf16.mxu1 %v723_v14  ;;  %v727_v19 = vpack.c.bf16 %v243_v16, %v242_v15  ;;  %v244_v20 = vld [vmem:[%s1041_s1 + $0x30] sm:$0xff]  ;;  %v245_v21 = vld [vmem:[%s1041_s1 + $0x38] sm:$0xff]  ;;  %v44_v57 = vlaneseq  ;;  %v799_v61 = vmov 1.0  }
  0x10   :  { %v33_v22 = vld [vmem:[%s1040_s0 + $0xa8] sm:$0xff]  ;;  %726 = vmatpush3.bf16.msra.mxu0 %v723_v14  ;;  %760 = vmatpush3.bf16.msra.mxu1 %v723_v14  ;;  %v731_v24 = vpack.c.bf16 %v245_v21, %v244_v20  ;;  %v246_v25 = vld [vmem:[%s1041_s1 + $0x40] sm:$0xff]  ;;  %v34_v27 = vld [vmem:[%s1040_s0 + $0xb0] sm:$0xff] }
  0x11   :  { %v17_v23 = vld [vmem:[%s1040_s0 + $0x28] sm:$0xff]  ;;  %728 = vmatprep.subr.bf16.mxu0 %v727_v19  ;;  %753 = vmatprep.subr.bf16.mxu1 %v727_v19  ;;  %v18_v28 = vld [vmem:[%s1040_s0 + $0x30] sm:$0xff]  ;;  %v249_v31 = vld [vmem:[%s1041_s1 + $0x58] sm:$0xff]  ;;  %v962_v58 = vand.u32 127, %v44_v57 }
  0x12   :  { %107 = vperm.xlu1 %773, %v32_v17   ;;  %59 = vperm.xlu0 %772, %v16_v18   ;;  %v247_v26 = vld [vmem:[%s1041_s1 + $0x48] sm:$0xff]  ;;  %v248_v30 = vld [vmem:[%s1041_s1 + $0x50] sm:$0xff]  ;;  %v35_v32 = vld [vmem:[%s1040_s0 + $0xb8] sm:$0xff] }
  0x13   :  { %v735_v29 = vpack.c.bf16 %v247_v26, %v246_v25  ;;  %v19_v33 = vld [vmem:[%s1040_s0 + $0x38] sm:$0xff]  ;;  %v739_v34 = vpack.c.bf16 %v249_v31, %v248_v30  ;;  %v250_v35 = vld [vmem:[%s1041_s1 + $0x60] sm:$0xff]  ;;  %v251_v36 = vld [vmem:[%s1041_s1 + $0x68] sm:$0xff] }
  0x14   :  { %730 = vmatpush3.bf16.msra.mxu0 %v727_v19  ;;  %761 = vmatpush3.bf16.msra.mxu1 %v727_v19  ;;  %v36_v37 = vld [vmem:[%s1040_s0 + $0xc0] sm:$0xff]  ;;  %v743_v39 = vpack.c.bf16 %v251_v36, %v250_v35  ;;  %v252_v40 = vld [vmem:[%s1041_s1 + $0x70] sm:$0xff]  ;;  %v253_v41 = vld [vmem:[%s1041_s1 + $0x78] sm:$0xff] }
  0x15   :  { %732 = vmatprep.subr.bf16.mxu0 %v731_v24  ;;  %754 = vmatprep.subr.bf16.mxu1 %v731_v24  ;;  %v20_v38 = vld [vmem:[%s1040_s0 + $0x40] sm:$0xff]  ;;  %v37_v42 = vld [vmem:[%s1040_s0 + $0xc8] sm:$0xff]  ;;  %v747_v44 = vpack.c.bf16 %v253_v41, %v252_v40  ;;  %v38_v45 = vld [vmem:[%s1040_s0 + $0xd0] sm:$0xff] }
  0x16   :  { %110 = vperm.xlu1 %773, %v33_v22   ;;  %62 = vperm.xlu0 %772, %v17_v23   ;;  %v21_v43 = vld [vmem:[%s1040_s0 + $0x48] sm:$0xff]  ;;  %v22_v46 = vld [vmem:[%s1040_s0 + $0x50] sm:$0xff]  ;;  %v39_v47 = vld [vmem:[%s1040_s0 + $0xd8] sm:$0xff] }
  0x17   :  { %v23_v48 = vld [vmem:[%s1040_s0 + $0x58] sm:$0xff]  ;;  %v40_v49 = vld [vmem:[%s1040_s0 + $0xe0] sm:$0xff]  ;;  %v41_v51 = vld [vmem:[%s1040_s0 + $0xe8] sm:$0xff] }
  0x18   :  { %734 = vmatpush3.bf16.msra.mxu0 %v731_v24  ;;  %762 = vmatpush3.bf16.msra.mxu1 %v731_v24  ;;  %v24_v50 = vld [vmem:[%s1040_s0 + $0x60] sm:$0xff]  ;;  %v25_v52 = vld [vmem:[%s1040_s0 + $0x68] sm:$0xff]  ;;  %v42_v53 = vld [vmem:[%s1040_s0 + $0xf0] sm:$0xff] }
  0x19   :  { %736 = vmatprep.subr.bf16.mxu0 %v735_v29  ;;  %755 = vmatprep.subr.bf16.mxu1 %v735_v29  ;;  %v26_v54 = vld [vmem:[%s1040_s0 + $0x70] sm:$0xff]  ;;  %v43_v55 = vld [vmem:[%s1040_s0 + $0xf8] sm:$0xff] }
  0x1a   :  { %113 = vperm.xlu1 %773, %v34_v27   ;;  %65 = vperm.xlu0 %772, %v18_v28   ;;  %v27_v56 = vld [vmem:[%s1040_s0 + $0x78] sm:$0xff]  ;;  %s800_s0 = smov [#allocation2]  }
  0x1b   :  { %s516_s20 = sshll.u32 %s800_s0, 4  ;;  %s517_s20 = int_to_ptr.vmem [resolvable:$true] %s516_s20 }
  0x1c   :  { %738 = vmatpush3.bf16.msra.mxu0 %v735_v29  ;;  %763 = vmatpush3.bf16.msra.mxu1 %v735_v29  ;;  %s774_s21 = scalar_lea.vmem %s517_s20, 4096  ;;  %p779_p1 = scmp.lt.s32.totalorder %s517_s20, %s517_s20 }
  0x1d   :  { %740 = vmatprep.subr.bf16.mxu0 %v739_v34  ;;  %756 = vmatprep.subr.bf16.mxu1 %v739_v34  ;;  %p775_p0 = scmp.ne.s32.totalorder %s517_s20, %s774_s21  ;;  %p780_p2 = scmp.lt.s32.totalorder %s774_s21, %s774_s21 }
  0x1e   :  { %116 = vperm.xlu1 %773, %v35_v32   ;;  %68 = vperm.xlu0 %772, %v19_v33  }
  0x1f   :  { %p781_p3 = por %p780_p2, %p779_p1 }
  0x20   :  { %742 = vmatpush3.bf16.msra.mxu0 %v739_v34  ;;  %764 = vmatpush3.bf16.msra.mxu1 %v739_v34 }
  0x21   :  { %744 = vmatprep.subr.bf16.mxu0 %v743_v39  ;;  %757 = vmatprep.subr.bf16.mxu1 %v743_v39  ;;  %p782_p4 = pnand %p781_p3, %p775_p0 }
  0x22   :  { %119 = vperm.xlu1 %773, %v36_v37   ;;  %71 = vperm.xlu0 %772, %v20_v38  }
  0x24   :  { %746 = vmatpush3.bf16.msra.mxu0 %v743_v39  ;;  %765 = vmatpush3.bf16.msra.mxu1 %v743_v39 }
  0x25   :  { %748 = vmatprep.subr.bf16.mxu0 %v747_v44  ;;  %758 = vmatprep.subr.bf16.mxu1 %v747_v44 }
  0x26   :  { %122 = vperm.xlu1 %773, %v37_v42   ;;  %74 = vperm.xlu0 %772, %v21_v43  }
  0x28   :  { %750 = vmatpush3.bf16.msra.mxu0 %v747_v44  ;;  %766 = vmatpush3.bf16.msra.mxu1 %v747_v44 }
  0x2a   :  { %125 = vperm.xlu1 %773, %v38_v45   ;;  %77 = vperm.xlu0 %772, %v22_v46  }
  0x2e   :  { %128 = vperm.xlu1 %773, %v39_v47   ;;  %80 = vperm.xlu0 %772, %v23_v48  }
  0x32   :  { %131 = vperm.xlu1 %773, %v40_v49   ;;  %83 = vperm.xlu0 %772, %v24_v50  }
  0x36   :  { %134 = vperm.xlu1 %773, %v41_v51   ;;  %86 = vperm.xlu0 %772, %v25_v52  }
  0x3a   :  { %137 = vperm.xlu1 %773, %v42_v53   ;;  %89 = vperm.xlu0 %772, %v26_v54  }
  0x3e   :  { %140 = vperm.xlu1 %773, %v43_v55   ;;  %92 = vperm.xlu0 %772, %v27_v56  }
  0x81   :  { %v51_v59 = vpop.permute.xlu1 %50  ;;  %v48_v60 = vpop.permute.xlu0 %47 }
  0x82   :  { %vm143_vm0 = vcmp.eq.s32.totalorder %v51_v59, %v962_v58  ;;  %vm142_vm1 = vcmp.eq.s32.totalorder %v48_v60, %v962_v58 }
  0x83   :  { %671 = vmatprep.mubr.msk.f32.mxu0 %vm142_vm1, %v799_v61 }
  0x84   :  { %672 = vmatmul.mubr.msk.f32.vlgmr.msra.gmra.mrb[0].mxu0 %vm143_vm0, %v799_v61 }
  0x85   :  { %v99_v62 = vpop.permute.xlu1 %98  ;;  %v96_v63 = vpop.permute.xlu0 %95 }
  0x86   :  { %vm159_vm2 = vcmp.eq.s32.totalorder %v99_v62, %v962_v58  ;;  %vm158_vm3 = vcmp.eq.s32.totalorder %v96_v63, %v962_v58 }
  0x87   :  { %695 = vmatprep.mubr.msk.f32.mxu1 %vm158_vm3, %v799_v61 }
  0x88   :  { %696 = vmatmul.mubr.msk.f32.vlgmr.msra.gmra.mrb[0].mxu1 %vm159_vm2, %v799_v61 }
  0x89   :  { %v102_v0 = vpop.permute.xlu1 %101  ;;  %v54_v1 = vpop.permute.xlu0 %53 }
  0x8a   :  { %vm160_vm4 = vcmp.eq.s32.totalorder %v102_v0, %v962_v58  ;;  %vm144_vm5 = vcmp.eq.s32.totalorder %v54_v1, %v962_v58 }
  0x8b   :  { %674 = vmatprep.mubr.msk.f32.mxu0 %vm144_vm5, %v799_v61  ;;  %698 = vmatprep.mubr.msk.f32.mxu1 %vm160_vm4, %v799_v61 }
  0x8d   :  { %v105_v2 = vpop.permute.xlu1 %104  ;;  %v57_v3 = vpop.permute.xlu0 %56 }
  0x8e   :  { %vm161_vm6 = vcmp.eq.s32.totalorder %v105_v2, %v962_v58  ;;  %vm145_vm7 = vcmp.eq.s32.totalorder %v57_v3, %v962_v58 }
  0x8f   :  { %675 = vmatmul.mubr.msk.f32.gmra.mrb[2].mxu0 %vm145_vm7, %v799_v61  ;;  %699 = vmatmul.mubr.msk.f32.gmra.mrb[2].mxu1 %vm161_vm6, %v799_v61 }
  0x91   :  { %v108_v4 = vpop.permute.xlu1 %107  ;;  %v60_v5 = vpop.permute.xlu0 %59 }
  0x92   :  { %vm162_vm8 = vcmp.eq.s32.totalorder %v108_v4, %v962_v58  ;;  %vm146_vm9 = vcmp.eq.s32.totalorder %v60_v5, %v962_v58 }
  0x93   :  { %677 = vmatprep.mubr.msk.f32.mxu0 %vm146_vm9, %v799_v61  ;;  %701 = vmatprep.mubr.msk.f32.mxu1 %vm162_vm8, %v799_v61 }
  0x95   :  { %v111_v6 = vpop.permute.xlu1 %110  ;;  %v63_v7 = vpop.permute.xlu0 %62 }
  0x96   :  { %vm163_vm10 = vcmp.eq.s32.totalorder %v111_v6, %v962_v58  ;;  %vm147_vm11 = vcmp.eq.s32.totalorder %v63_v7, %v962_v58 }
  0x97   :  { %678 = vmatmul.mubr.msk.f32.gmra.mrb[4].mxu0 %vm147_vm11, %v799_v61  ;;  %702 = vmatmul.mubr.msk.f32.gmra.mrb[4].mxu1 %vm163_vm10, %v799_v61 }
  0x99   :  { %v114_v8 = vpop.permute.xlu1 %113  ;;  %v66_v9 = vpop.permute.xlu0 %65 }
  0x9a   :  { %vm164_vm12 = vcmp.eq.s32.totalorder %v114_v8, %v962_v58  ;;  %vm148_vm13 = vcmp.eq.s32.totalorder %v66_v9, %v962_v58 }
  0x9b   :  { %680 = vmatprep.mubr.msk.f32.mxu0 %vm148_vm13, %v799_v61  ;;  %704 = vmatprep.mubr.msk.f32.mxu1 %vm164_vm12, %v799_v61 }
  0x9d   :  { %v117_v10 = vpop.permute.xlu1 %116  ;;  %v69_v11 = vpop.permute.xlu0 %68 }
  0x9e   :  { %vm165_vm14 = vcmp.eq.s32.totalorder %v117_v10, %v962_v58  ;;  %vm149_vm15 = vcmp.eq.s32.totalorder %v69_v11, %v962_v58 }
  0x9f   :  { %681 = vmatmul.mubr.msk.f32.gmra.mrb[6].mxu0 %vm149_vm15, %v799_v61  ;;  %705 = vmatmul.mubr.msk.f32.gmra.mrb[6].mxu1 %vm165_vm14, %v799_v61 }
  0xa1   :  { %v120_v12 = vpop.permute.xlu1 %119  ;;  %v72_v13 = vpop.permute.xlu0 %71 }
  0xa2   :  { %vm166_vm0 = vcmp.eq.s32.totalorder %v120_v12, %v962_v58  ;;  %vm150_vm1 = vcmp.eq.s32.totalorder %v72_v13, %v962_v58 }
  0xa3   :  { %683 = vmatprep.mubr.msk.f32.mxu0 %vm150_vm1, %v799_v61  ;;  %707 = vmatprep.mubr.msk.f32.mxu1 %vm166_vm0, %v799_v61 }
  0xa5   :  { %v123_v14 = vpop.permute.xlu1 %122  ;;  %v75_v15 = vpop.permute.xlu0 %74 }
  0xa6   :  { %vm167_vm2 = vcmp.eq.s32.totalorder %v123_v14, %v962_v58  ;;  %vm151_vm3 = vcmp.eq.s32.totalorder %v75_v15, %v962_v58 }
  0xa7   :  { %684 = vmatmul.mubr.msk.f32.gmra.mrb[8].mxu0 %vm151_vm3, %v799_v61  ;;  %708 = vmatmul.mubr.msk.f32.gmra.mrb[8].mxu1 %vm167_vm2, %v799_v61 }
  0xa9   :  { %v126_v16 = vpop.permute.xlu1 %125  ;;  %v78_v17 = vpop.permute.xlu0 %77 }
  0xaa   :  { %vm168_vm4 = vcmp.eq.s32.totalorder %v126_v16, %v962_v58  ;;  %vm152_vm5 = vcmp.eq.s32.totalorder %v78_v17, %v962_v58 }
  0xab   :  { %686 = vmatprep.mubr.msk.f32.mxu0 %vm152_vm5, %v799_v61  ;;  %710 = vmatprep.mubr.msk.f32.mxu1 %vm168_vm4, %v799_v61 }
  0xad   :  { %v129_v18 = vpop.permute.xlu1 %128  ;;  %v81_v19 = vpop.permute.xlu0 %80 }
  0xae   :  { %vm169_vm6 = vcmp.eq.s32.totalorder %v129_v18, %v962_v58  ;;  %vm153_vm7 = vcmp.eq.s32.totalorder %v81_v19, %v962_v58 }
  0xaf   :  { %687 = vmatmul.mubr.msk.f32.gmra.mrb[10].mxu0 %vm153_vm7, %v799_v61  ;;  %711 = vmatmul.mubr.msk.f32.gmra.mrb[10].mxu1 %vm169_vm6, %v799_v61 }
  0xb1   :  { %v132_v20 = vpop.permute.xlu1 %131  ;;  %v84_v21 = vpop.permute.xlu0 %83 }
  0xb2   :  { %vm170_vm8 = vcmp.eq.s32.totalorder %v132_v20, %v962_v58  ;;  %vm154_vm9 = vcmp.eq.s32.totalorder %v84_v21, %v962_v58 }
  0xb3   :  { %689 = vmatprep.mubr.msk.f32.mxu0 %vm154_vm9, %v799_v61  ;;  %713 = vmatprep.mubr.msk.f32.mxu1 %vm170_vm8, %v799_v61 }
  0xb5   :  { %v135_v22 = vpop.permute.xlu1 %134  ;;  %v87_v23 = vpop.permute.xlu0 %86 }
  0xb6   :  { %vm171_vm10 = vcmp.eq.s32.totalorder %v135_v22, %v962_v58  ;;  %vm155_vm11 = vcmp.eq.s32.totalorder %v87_v23, %v962_v58 }
  0xb7   :  { %690 = vmatmul.mubr.msk.f32.gmra.mrb[12].mxu0 %vm155_vm11, %v799_v61  ;;  %714 = vmatmul.mubr.msk.f32.gmra.mrb[12].mxu1 %vm171_vm10, %v799_v61 }
  0xb9   :  { %v138_v24 = vpop.permute.xlu1 %137  ;;  %v90_v25 = vpop.permute.xlu0 %89 }
  0xba   :  { %vm172_vm12 = vcmp.eq.s32.totalorder %v138_v24, %v962_v58  ;;  %vm156_vm13 = vcmp.eq.s32.totalorder %v90_v25, %v962_v58 }
  0xbb   :  { %692 = vmatprep.mubr.msk.f32.mxu0 %vm156_vm13, %v799_v61  ;;  %716 = vmatprep.mubr.msk.f32.mxu1 %vm172_vm12, %v799_v61 }
  0xbd   :  { %v141_v26 = vpop.permute.xlu1 %140  ;;  %v93_v27 = vpop.permute.xlu0 %92 }
  0xbe   :  { %vm173_vm14 = vcmp.eq.s32.totalorder %v141_v26, %v962_v58  ;;  %vm157_vm15 = vcmp.eq.s32.totalorder %v93_v27, %v962_v58 }
  0xbf   :  { %693 = vmatmul.mubr.msk.f32.gmra.mrb[14].mxu0 %vm157_vm15, %v799_v61  ;;  %717 = vmatmul.mubr.msk.f32.gmra.mrb[14].mxu1 %vm173_vm14, %v799_v61 }
 0x157   :  { %v673_v28 = vpop.f32.mrb[0].mxu0 }
 0x158   :  { %480 = vst [vmem:[#allocation2 + $0x8] sm:$0xff] %v673_v28  ;;  %v320_v29 = vpop.f32.mrb[1].mxu0 }
 0x159   :  { %479 = vst [vmem:[#allocation2] sm:$0xff] %v320_v29 }
 0x15b   :  { %v697_v30 = vpop.f32.mrb[0].mxu1 }
 0x15c   :  { %496 = vst [vmem:[#allocation2 + $0x88] sm:$0xff] %v697_v30  ;;  %v400_v31 = vpop.f32.mrb[1].mxu1 }
 0x15d   :  { %495 = vst [vmem:[#allocation2 + $0x80] sm:$0xff] %v400_v31 }
 0x162   :  { %v676_v32 = vpop.f32.mrb[2].mxu0  ;;  %v700_v33 = vpop.f32.mrb[2].mxu1 }
 0x163   :  { %482 = vst [vmem:[#allocation2 + $0x18] sm:$0xff] %v676_v32  ;;  %498 = vst [vmem:[#allocation2 + $0x98] sm:$0xff] %v700_v33  ;;  %v330_v34 = vpop.f32.mrb[3].mxu0  ;;  %v410_v35 = vpop.f32.mrb[3].mxu1 }
 0x164   :  { %481 = vst [vmem:[#allocation2 + $0x10] sm:$0xff] %v330_v34  ;;  %497 = vst [vmem:[#allocation2 + $0x90] sm:$0xff] %v410_v35 }
 0x16a   :  { %v679_v36 = vpop.f32.mrb[4].mxu0  ;;  %v703_v37 = vpop.f32.mrb[4].mxu1 }
 0x16b   :  { %484 = vst [vmem:[#allocation2 + $0x28] sm:$0xff] %v679_v36  ;;  %500 = vst [vmem:[#allocation2 + $0xa8] sm:$0xff] %v703_v37  ;;  %v340_v38 = vpop.f32.mrb[5].mxu0  ;;  %v420_v39 = vpop.f32.mrb[5].mxu1 }
 0x16c   :  { %483 = vst [vmem:[#allocation2 + $0x20] sm:$0xff] %v340_v38  ;;  %499 = vst [vmem:[#allocation2 + $0xa0] sm:$0xff] %v420_v39 }
 0x172   :  { %v682_v40 = vpop.f32.mrb[6].mxu0  ;;  %v706_v41 = vpop.f32.mrb[6].mxu1 }
 0x173   :  { %486 = vst [vmem:[#allocation2 + $0x38] sm:$0xff] %v682_v40  ;;  %502 = vst [vmem:[#allocation2 + $0xb8] sm:$0xff] %v706_v41  ;;  %v350_v42 = vpop.f32.mrb[7].mxu0  ;;  %v430_v43 = vpop.f32.mrb[7].mxu1 }
 0x174   :  { %485 = vst [vmem:[#allocation2 + $0x30] sm:$0xff] %v350_v42  ;;  %501 = vst [vmem:[#allocation2 + $0xb0] sm:$0xff] %v430_v43 }
 0x17a   :  { %v685_v44 = vpop.f32.mrb[8].mxu0  ;;  %v709_v45 = vpop.f32.mrb[8].mxu1 }
 0x17b   :  { %488 = vst [vmem:[#allocation2 + $0x48] sm:$0xff] %v685_v44  ;;  %504 = vst [vmem:[#allocation2 + $0xc8] sm:$0xff] %v709_v45  ;;  %v360_v46 = vpop.f32.mrb[9].mxu0  ;;  %v440_v47 = vpop.f32.mrb[9].mxu1 }
 0x17c   :  { %487 = vst [vmem:[#allocation2 + $0x40] sm:$0xff] %v360_v46  ;;  %503 = vst [vmem:[#allocation2 + $0xc0] sm:$0xff] %v440_v47 }
 0x182   :  { %v688_v48 = vpop.f32.mrb[10].mxu0  ;;  %v712_v49 = vpop.f32.mrb[10].mxu1 }
 0x183   :  { %490 = vst [vmem:[#allocation2 + $0x58] sm:$0xff] %v688_v48  ;;  %506 = vst [vmem:[#allocation2 + $0xd8] sm:$0xff] %v712_v49  ;;  %v370_v50 = vpop.f32.mrb[11].mxu0  ;;  %v450_v51 = vpop.f32.mrb[11].mxu1 }
 0x184   :  { %489 = vst [vmem:[#allocation2 + $0x50] sm:$0xff] %v370_v50  ;;  %505 = vst [vmem:[#allocation2 + $0xd0] sm:$0xff] %v450_v51 }
 0x18a   :  { %v691_v52 = vpop.f32.mrb[12].mxu0  ;;  %v715_v53 = vpop.f32.mrb[12].mxu1 }
 0x18b   :  { %492 = vst [vmem:[#allocation2 + $0x68] sm:$0xff] %v691_v52  ;;  %508 = vst [vmem:[#allocation2 + $0xe8] sm:$0xff] %v715_v53  ;;  %v380_v54 = vpop.f32.mrb[13].mxu0  ;;  %v460_v55 = vpop.f32.mrb[13].mxu1 }
 0x18c   :  { %491 = vst [vmem:[#allocation2 + $0x60] sm:$0xff] %v380_v54  ;;  %507 = vst [vmem:[#allocation2 + $0xe0] sm:$0xff] %v460_v55 }
 0x192   :  { %v694_v56 = vpop.f32.mrb[14].mxu0  ;;  %v718_v57 = vpop.f32.mrb[14].mxu1 }
 0x193   :  { %494 = vst [vmem:[#allocation2 + $0x78] sm:$0xff] %v694_v56  ;;  %510 = vst [vmem:[#allocation2 + $0xf8] sm:$0xff] %v718_v57  ;;  %v390_v58 = vpop.f32.mrb[15].mxu0  ;;  %v470_v59 = vpop.f32.mrb[15].mxu1 }
 0x194   :  { %493 = vst [vmem:[#allocation2 + $0x70] sm:$0xff] %v390_v58  ;;  %509 = vst [vmem:[#allocation2 + $0xf0] sm:$0xff] %v470_v59 }
 0x195   :  { %785 = shalt.err (!%p782_p4)
}
 0x196   :  { %s786_s24 = scalar_lea.hbm %s1042_s2, 4096 }
 0x197   :  { %p787_p5 = scmp.ne.s32.totalorder %s1042_s2, %s786_s24  ;;  %p790_p6 = scmp.lt.u32.totalorder %s786_s24, %s1042_s2 }
 0x199   :  { %p792_p7 = pnand %p790_p6, %p787_p5 }
 0x19b   :  { %795 = shalt.err (!%p792_p7)
}
 0x19c   :  { %s801_s28 = smov 128   ;;  %s802_s29 = smov 8  }
 0x19d   :  { %522 = dma.vmem_to_hbm [thread:$0]  %s517_s20, 4096, %s1042_s2, [#allocation3], %s801_s28, %s801_s28, %s802_s29  }
 0x19e   :  { %796 = dma.done.wait [#allocation3], 4096  }
 0x19f   :  { %797 = vsyncadd [#allocation3], 4294963200 }
 0x1a0   :  { %526 = vsyncpa [#allocation3], 1 }

// kernel: tpu_custom_call.1
= control target key start
LH: loop header
LB: loop body
LE: loop exit
PB: predicated region body
PF: predicated region fallthrough
CT: control target
= control target key end

     0   :  { %v798_v2 = vmov 0   ;;  %s1040_s0 = inlined_call_operand.vmem [shape: s32[256,1], index: 0, kind: input, shape index: {}]   ;;  %s1041_s1 = inlined_call_operand.vmem [shape: f32[128,128], index: 1, kind: input, shape index: {}]   ;;  %s1042_s2 = inlined_call_operand.hbm [shape: f32[256,128], index: 2, kind: output, shape index: {}]  }
   0x1   :  { %v13_v0 = vld [vmem:[%s1040_s0 + $0x8] sm:$0xff]  ;;  %v12_v1 = vld [vmem:[%s1040_s0] sm:$0xff]  ;;  %773 = vset.pattern.permute.xlu1 %v798_v2  ;;  %772 = vset.pattern.permute.xlu0 %v798_v2  ;;  %v30_v5 = vld [vmem:[%s1040_s0 + $0x90] sm:$0xff] }
   0x2   :  { %50 = vperm.xlu1 %773, %v13_v0   ;;  %47 = vperm.xlu0 %772, %v12_v1   ;;  %v29_v3 = vld [vmem:[%s1040_s0 + $0x88] sm:$0xff]  ;;  %v28_v4 = vld [vmem:[%s1040_s0 + $0x80] sm:$0xff]  ;;  %v14_v6 = vld [vmem:[%s1040_s0 + $0x10] sm:$0xff] }
   0x3   :  { %v31_v7 = vld [vmem:[%s1040_s0 + $0x98] sm:$0xff]  ;;  %v238_v9 = vld [vmem:[%s1041_s1] sm:$0xff]  ;;  %v239_v10 = vld [vmem:[%s1041_s1 + $0x8] sm:$0xff] }
   0x4   :  { %v15_v8 = vld [vmem:[%s1040_s0 + $0x18] sm:$0xff]  ;;  %v240_v11 = vld [vmem:[%s1041_s1 + $0x10] sm:$0xff]  ;;  %v719_v13 = vpack.c.bf16 %v239_v10, %v238_v9  ;;  %v242_v15 = vld [vmem:[%s1041_s1 + $0x20] sm:$0xff] }
   0x5   :  { %v241_v12 = vld [vmem:[%s1041_s1 + $0x18] sm:$0xff]  ;;  %v243_v16 = vld [vmem:[%s1041_s1 + $0x28] sm:$0xff]  ;;  %v32_v17 = vld [vmem:[%s1040_s0 + $0xa0] sm:$0xff] }
   0x6   :  { %98 = vperm.xlu1 %773, %v29_v3   ;;  %95 = vperm.xlu0 %772, %v28_v4   ;;  %v723_v14 = vpack.c.bf16 %v241_v12, %v240_v11  ;;  %v16_v18 = vld [vmem:[%s1040_s0 + $0x20] sm:$0xff] }
   0x7   :  { %720 = vmatprep.subr.bf16.mxu0 %v719_v13  ;;  %751 = vmatprep.subr.bf16.mxu1 %v719_v13 }
   0x8   :  { %722 = vmatpush3.bf16.msra.mxu0 %v719_v13  ;;  %759 = vmatpush3.bf16.msra.mxu1 %v719_v13 }
   0xa   :  { %101 = vperm.xlu1 %773, %v30_v5   ;;  %53 = vperm.xlu0 %772, %v14_v6  }
   0xe   :  { %104 = vperm.xlu1 %773, %v31_v7   ;;  %56 = vperm.xlu0 %772, %v15_v8  }
   0xf   :  { %7 = vsyncpa [#allocation3], 0  ;;  %724 = vmatprep.subr.bf16.mxu0 %v723_v14  ;;  %752 = vmatprep.subr.bf16.mxu1 %v723_v14  ;;  %v727_v19 = vpack.c.bf16 %v243_v16, %v242_v15  ;;  %v244_v20 = vld [vmem:[%s1041_s1 + $0x30] sm:$0xff]  ;;  %v245_v21 = vld [vmem:[%s1041_s1 + $0x38] sm:$0xff]  ;;  %v44_v57 = vlaneseq  ;;  %v799_v61 = vmov 1.0  }
  0x10   :  { %v33_v22 = vld [vmem:[%s1040_s0 + $0xa8] sm:$0xff]  ;;  %726 = vmatpush3.bf16.msra.mxu0 %v723_v14  ;;  %760 = vmatpush3.bf16.msra.mxu1 %v723_v14  ;;  %v731_v24 = vpack.c.bf16 %v245_v21, %v244_v20  ;;  %v246_v25 = vld [vmem:[%s1041_s1 + $0x40] sm:$0xff]  ;;  %v34_v27 = vld [vmem:[%s1040_s0 + $0xb0] sm:$0xff] }
  0x11   :  { %v17_v23 = vld [vmem:[%s1040_s0 + $0x28] sm:$0xff]  ;;  %728 = vmatprep.subr.bf16.mxu0 %v727_v19  ;;  %753 = vmatprep.subr.bf16.mxu1 %v727_v19  ;;  %v18_v28 = vld [vmem:[%s1040_s0 + $0x30] sm:$0xff]  ;;  %v249_v31 = vld [vmem:[%s1041_s1 + $0x58] sm:$0xff]  ;;  %v962_v58 = vand.u32 127, %v44_v57 }
  0x12   :  { %107 = vperm.xlu1 %773, %v32_v17   ;;  %59 = vperm.xlu0 %772, %v16_v18   ;;  %v247_v26 = vld [vmem:[%s1041_s1 + $0x48] sm:$0xff]  ;;  %v248_v30 = vld [vmem:[%s1041_s1 + $0x50] sm:$0xff]  ;;  %v35_v32 = vld [vmem:[%s1040_s0 + $0xb8] sm:$0xff] }
  0x13   :  { %v735_v29 = vpack.c.bf16 %v247_v26, %v246_v25  ;;  %v19_v33 = vld [vmem:[%s1040_s0 + $0x38] sm:$0xff]  ;;  %v739_v34 = vpack.c.bf16 %v249_v31, %v248_v30  ;;  %v250_v35 = vld [vmem:[%s1041_s1 + $0x60] sm:$0xff]  ;;  %v251_v36 = vld [vmem:[%s1041_s1 + $0x68] sm:$0xff] }
  0x14   :  { %730 = vmatpush3.bf16.msra.mxu0 %v727_v19  ;;  %761 = vmatpush3.bf16.msra.mxu1 %v727_v19  ;;  %v36_v37 = vld [vmem:[%s1040_s0 + $0xc0] sm:$0xff]  ;;  %v743_v39 = vpack.c.bf16 %v251_v36, %v250_v35  ;;  %v252_v40 = vld [vmem:[%s1041_s1 + $0x70] sm:$0xff]  ;;  %v253_v41 = vld [vmem:[%s1041_s1 + $0x78] sm:$0xff] }
  0x15   :  { %732 = vmatprep.subr.bf16.mxu0 %v731_v24  ;;  %754 = vmatprep.subr.bf16.mxu1 %v731_v24  ;;  %v20_v38 = vld [vmem:[%s1040_s0 + $0x40] sm:$0xff]  ;;  %v37_v42 = vld [vmem:[%s1040_s0 + $0xc8] sm:$0xff]  ;;  %v747_v44 = vpack.c.bf16 %v253_v41, %v252_v40  ;;  %v38_v45 = vld [vmem:[%s1040_s0 + $0xd0] sm:$0xff] }
  0x16   :  { %110 = vperm.xlu1 %773, %v33_v22   ;;  %62 = vperm.xlu0 %772, %v17_v23   ;;  %v21_v43 = vld [vmem:[%s1040_s0 + $0x48] sm:$0xff]  ;;  %v22_v46 = vld [vmem:[%s1040_s0 + $0x50] sm:$0xff]  ;;  %v39_v47 = vld [vmem:[%s1040_s0 + $0xd8] sm:$0xff] }
  0x17   :  { %v23_v48 = vld [vmem:[%s1040_s0 + $0x58] sm:$0xff]  ;;  %v40_v49 = vld [vmem:[%s1040_s0 + $0xe0] sm:$0xff]  ;;  %v41_v51 = vld [vmem:[%s1040_s0 + $0xe8] sm:$0xff] }
  0x18   :  { %734 = vmatpush3.bf16.msra.mxu0 %v731_v24  ;;  %762 = vmatpush3.bf16.msra.mxu1 %v731_v24  ;;  %v24_v50 = vld [vmem:[%s1040_s0 + $0x60] sm:$0xff]  ;;  %v25_v52 = vld [vmem:[%s1040_s0 + $0x68] sm:$0xff]  ;;  %v42_v53 = vld [vmem:[%s1040_s0 + $0xf0] sm:$0xff] }
  0x19   :  { %736 = vmatprep.subr.bf16.mxu0 %v735_v29  ;;  %755 = vmatprep.subr.bf16.mxu1 %v735_v29  ;;  %v26_v54 = vld [vmem:[%s1040_s0 + $0x70] sm:$0xff]  ;;  %v43_v55 = vld [vmem:[%s1040_s0 + $0xf8] sm:$0xff] }
  0x1a   :  { %113 = vperm.xlu1 %773, %v34_v27   ;;  %65 = vperm.xlu0 %772, %v18_v28   ;;  %v27_v56 = vld [vmem:[%s1040_s0 + $0x78] sm:$0xff]  ;;  %s800_s0 = smov [#allocation2]  }
  0x1b   :  { %s516_s20 = sshll.u32 %s800_s0, 4  ;;  %s517_s20 = int_to_ptr.vmem [resolvable:$true] %s516_s20 }
  0x1c   :  { %738 = vmatpush3.bf16.msra.mxu0 %v735_v29  ;;  %763 = vmatpush3.bf16.msra.mxu1 %v735_v29  ;;  %s774_s21 = scalar_lea.vmem %s517_s20, 4096  ;;  %p779_p1 = scmp.lt.s32.totalorder %s517_s20, %s517_s20 }
  0x1d   :  { %740 = vmatprep.subr.bf16.mxu0 %v739_v34  ;;  %756 = vmatprep.subr.bf16.mxu1 %v739_v34  ;;  %p775_p0 = scmp.ne.s32.totalorder %s517_s20, %s774_s21  ;;  %p780_p2 = scmp.lt.s32.totalorder %s774_s21, %s774_s21 }
  0x1e   :  { %116 = vperm.xlu1 %773, %v35_v32   ;;  %68 = vperm.xlu0 %772, %v19_v33  }
  0x1f   :  { %p781_p3 = por %p780_p2, %p779_p1 }
  0x20   :  { %742 = vmatpush3.bf16.msra.mxu0 %v739_v34  ;;  %764 = vmatpush3.bf16.msra.mxu1 %v739_v34 }
  0x21   :  { %744 = vmatprep.subr.bf16.mxu0 %v743_v39  ;;  %757 = vmatprep.subr.bf16.mxu1 %v743_v39  ;;  %p782_p4 = pnand %p781_p3, %p775_p0 }
  0x22   :  { %119 = vperm.xlu1 %773, %v36_v37   ;;  %71 = vperm.xlu0 %772, %v20_v38  }
  0x24   :  { %746 = vmatpush3.bf16.msra.mxu0 %v743_v39  ;;  %765 = vmatpush3.bf16.msra.mxu1 %v743_v39 }
  0x25   :  { %748 = vmatprep.subr.bf16.mxu0 %v747_v44  ;;  %758 = vmatprep.subr.bf16.mxu1 %v747_v44 }
  0x26   :  { %122 = vperm.xlu1 %773, %v37_v42   ;;  %74 = vperm.xlu0 %772, %v21_v43  }
  0x28   :  { %750 = vmatpush3.bf16.msra.mxu0 %v747_v44  ;;  %766 = vmatpush3.bf16.msra.mxu1 %v747_v44 }
  0x2a   :  { %125 = vperm.xlu1 %773, %v38_v45   ;;  %77 = vperm.xlu0 %772, %v22_v46  }
  0x2e   :  { %128 = vperm.xlu1 %773, %v39_v47   ;;  %80 = vperm.xlu0 %772, %v23_v48  }
  0x32   :  { %131 = vperm.xlu1 %773, %v40_v49   ;;  %83 = vperm.xlu0 %772, %v24_v50  }
  0x36   :  { %134 = vperm.xlu1 %773, %v41_v51   ;;  %86 = vperm.xlu0 %772, %v25_v52  }
  0x3a   :  { %137 = vperm.xlu1 %773, %v42_v53   ;;  %89 = vperm.xlu0 %772, %v26_v54  }
  0x3e   :  { %140 = vperm.xlu1 %773, %v43_v55   ;;  %92 = vperm.xlu0 %772, %v27_v56  }
  0x81   :  { %v51_v59 = vpop.permute.xlu1 %50  ;;  %v48_v60 = vpop.permute.xlu0 %47 }
  0x82   :  { %vm143_vm0 = vcmp.eq.s32.totalorder %v51_v59, %v962_v58  ;;  %vm142_vm1 = vcmp.eq.s32.totalorder %v48_v60, %v962_v58 }
  0x83   :  { %671 = vmatprep.mubr.msk.f32.mxu0 %vm142_vm1, %v799_v61 }
  0x84   :  { %672 = vmatmul.mubr.msk.f32.vlgmr.msra.gmra.mrb[0].mxu0 %vm143_vm0, %v799_v61 }
  0x85   :  { %v99_v62 = vpop.permute.xlu1 %98  ;;  %v96_v63 = vpop.permute.xlu0 %95 }
  0x86   :  { %vm159_vm2 = vcmp.eq.s32.totalorder %v99_v62, %v962_v58  ;;  %vm158_vm3 = vcmp.eq.s32.totalorder %v96_v63, %v962_v58 }
  0x87   :  { %695 = vmatprep.mubr.msk.f32.mxu1 %vm158_vm3, %v799_v61 }
  0x88   :  { %696 = vmatmul.mubr.msk.f32.vlgmr.msra.gmra.mrb[0].mxu1 %vm159_vm2, %v799_v61 }
  0x89   :  { %v102_v0 = vpop.permute.xlu1 %101  ;;  %v54_v1 = vpop.permute.xlu0 %53 }
  0x8a   :  { %vm160_vm4 = vcmp.eq.s32.totalorder %v102_v0, %v962_v58  ;;  %vm144_vm5 = vcmp.eq.s32.totalorder %v54_v1, %v962_v58 }
  0x8b   :  { %674 = vmatprep.mubr.msk.f32.mxu0 %vm144_vm5, %v799_v61  ;;  %698 = vmatprep.mubr.msk.f32.mxu1 %vm160_vm4, %v799_v61 }
  0x8d   :  { %v105_v2 = vpop.permute.xlu1 %104  ;;  %v57_v3 = vpop.permute.xlu0 %56 }
  0x8e   :  { %vm161_vm6 = vcmp.eq.s32.totalorder %v105_v2, %v962_v58  ;;  %vm145_vm7 = vcmp.eq.s32.totalorder %v57_v3, %v962_v58 }
  0x8f   :  { %675 = vmatmul.mubr.msk.f32.gmra.mrb[2].mxu0 %vm145_vm7, %v799_v61  ;;  %699 = vmatmul.mubr.msk.f32.gmra.mrb[2].mxu1 %vm161_vm6, %v799_v61 }
  0x91   :  { %v108_v4 = vpop.permute.xlu1 %107  ;;  %v60_v5 = vpop.permute.xlu0 %59 }
  0x92   :  { %vm162_vm8 = vcmp.eq.s32.totalorder %v108_v4, %v962_v58  ;;  %vm146_vm9 = vcmp.eq.s32.totalorder %v60_v5, %v962_v58 }
  0x93   :  { %677 = vmatprep.mubr.msk.f32.mxu0 %vm146_vm9, %v799_v61  ;;  %701 = vmatprep.mubr.msk.f32.mxu1 %vm162_vm8, %v799_v61 }
  0x95   :  { %v111_v6 = vpop.permute.xlu1 %110  ;;  %v63_v7 = vpop.permute.xlu0 %62 }
  0x96   :  { %vm163_vm10 = vcmp.eq.s32.totalorder %v111_v6, %v962_v58  ;;  %vm147_vm11 = vcmp.eq.s32.totalorder %v63_v7, %v962_v58 }
  0x97   :  { %678 = vmatmul.mubr.msk.f32.gmra.mrb[4].mxu0 %vm147_vm11, %v799_v61  ;;  %702 = vmatmul.mubr.msk.f32.gmra.mrb[4].mxu1 %vm163_vm10, %v799_v61 }
  0x99   :  { %v114_v8 = vpop.permute.xlu1 %113  ;;  %v66_v9 = vpop.permute.xlu0 %65 }
  0x9a   :  { %vm164_vm12 = vcmp.eq.s32.totalorder %v114_v8, %v962_v58  ;;  %vm148_vm13 = vcmp.eq.s32.totalorder %v66_v9, %v962_v58 }
  0x9b   :  { %680 = vmatprep.mubr.msk.f32.mxu0 %vm148_vm13, %v799_v61  ;;  %704 = vmatprep.mubr.msk.f32.mxu1 %vm164_vm12, %v799_v61 }
  0x9d   :  { %v117_v10 = vpop.permute.xlu1 %116  ;;  %v69_v11 = vpop.permute.xlu0 %68 }
  0x9e   :  { %vm165_vm14 = vcmp.eq.s32.totalorder %v117_v10, %v962_v58  ;;  %vm149_vm15 = vcmp.eq.s32.totalorder %v69_v11, %v962_v58 }
  0x9f   :  { %681 = vmatmul.mubr.msk.f32.gmra.mrb[6].mxu0 %vm149_vm15, %v799_v61  ;;  %705 = vmatmul.mubr.msk.f32.gmra.mrb[6].mxu1 %vm165_vm14, %v799_v61 }
  0xa1   :  { %v120_v12 = vpop.permute.xlu1 %119  ;;  %v72_v13 = vpop.permute.xlu0 %71 }
  0xa2   :  { %vm166_vm0 = vcmp.eq.s32.totalorder %v120_v12, %v962_v58  ;;  %vm150_vm1 = vcmp.eq.s32.totalorder %v72_v13, %v962_v58 }
  0xa3   :  { %683 = vmatprep.mubr.msk.f32.mxu0 %vm150_vm1, %v799_v61  ;;  %707 = vmatprep.mubr.msk.f32.mxu1 %vm166_vm0, %v799_v61 }
  0xa5   :  { %v123_v14 = vpop.permute.xlu1 %122  ;;  %v75_v15 = vpop.permute.xlu0 %74 }
  0xa6   :  { %vm167_vm2 = vcmp.eq.s32.totalorder %v123_v14, %v962_v58  ;;  %vm151_vm3 = vcmp.eq.s32.totalorder %v75_v15, %v962_v58 }
  0xa7   :  { %684 = vmatmul.mubr.msk.f32.gmra.mrb[8].mxu0 %vm151_vm3, %v799_v61  ;;  %708 = vmatmul.mubr.msk.f32.gmra.mrb[8].mxu1 %vm167_vm2, %v799_v61 }
  0xa9   :  { %v126_v16 = vpop.permute.xlu1 %125  ;;  %v78_v17 = vpop.permute.xlu0 %77 }
  0xaa   :  { %vm168_vm4 = vcmp.eq.s32.totalorder %v126_v16, %v962_v58  ;;  %vm152_vm5 = vcmp.eq.s32.totalorder %v78_v17, %v962_v58 }
  0xab   :  { %686 = vmatprep.mubr.msk.f32.mxu0 %vm152_vm5, %v799_v61  ;;  %710 = vmatprep.mubr.msk.f32.mxu1 %vm168_vm4, %v799_v61 }
  0xad   :  { %v129_v18 = vpop.permute.xlu1 %128  ;;  %v81_v19 = vpop.permute.xlu0 %80 }
  0xae   :  { %vm169_vm6 = vcmp.eq.s32.totalorder %v129_v18, %v962_v58  ;;  %vm153_vm7 = vcmp.eq.s32.totalorder %v81_v19, %v962_v58 }
  0xaf   :  { %687 = vmatmul.mubr.msk.f32.gmra.mrb[10].mxu0 %vm153_vm7, %v799_v61  ;;  %711 = vmatmul.mubr.msk.f32.gmra.mrb[10].mxu1 %vm169_vm6, %v799_v61 }
  0xb1   :  { %v132_v20 = vpop.permute.xlu1 %131  ;;  %v84_v21 = vpop.permute.xlu0 %83 }
  0xb2   :  { %vm170_vm8 = vcmp.eq.s32.totalorder %v132_v20, %v962_v58  ;;  %vm154_vm9 = vcmp.eq.s32.totalorder %v84_v21, %v962_v58 }
  0xb3   :  { %689 = vmatprep.mubr.msk.f32.mxu0 %vm154_vm9, %v799_v61  ;;  %713 = vmatprep.mubr.msk.f32.mxu1 %vm170_vm8, %v799_v61 }
  0xb5   :  { %v135_v22 = vpop.permute.xlu1 %134  ;;  %v87_v23 = vpop.permute.xlu0 %86 }
  0xb6   :  { %vm171_vm10 = vcmp.eq.s32.totalorder %v135_v22, %v962_v58  ;;  %vm155_vm11 = vcmp.eq.s32.totalorder %v87_v23, %v962_v58 }
  0xb7   :  { %690 = vmatmul.mubr.msk.f32.gmra.mrb[12].mxu0 %vm155_vm11, %v799_v61  ;;  %714 = vmatmul.mubr.msk.f32.gmra.mrb[12].mxu1 %vm171_vm10, %v799_v61 }
  0xb9   :  { %v138_v24 = vpop.permute.xlu1 %137  ;;  %v90_v25 = vpop.permute.xlu0 %89 }
  0xba   :  { %vm172_vm12 = vcmp.eq.s32.totalorder %v138_v24, %v962_v58  ;;  %vm156_vm13 = vcmp.eq.s32.totalorder %v90_v25, %v962_v58 }
  0xbb   :  { %692 = vmatprep.mubr.msk.f32.mxu0 %vm156_vm13, %v799_v61  ;;  %716 = vmatprep.mubr.msk.f32.mxu1 %vm172_vm12, %v799_v61 }
  0xbd   :  { %v141_v26 = vpop.permute.xlu1 %140  ;;  %v93_v27 = vpop.permute.xlu0 %92 }
  0xbe   :  { %vm173_vm14 = vcmp.eq.s32.totalorder %v141_v26, %v962_v58  ;;  %vm157_vm15 = vcmp.eq.s32.totalorder %v93_v27, %v962_v58 }
  0xbf   :  { %693 = vmatmul.mubr.msk.f32.gmra.mrb[14].mxu0 %vm157_vm15, %v799_v61  ;;  %717 = vmatmul.mubr.msk.f32.gmra.mrb[14].mxu1 %vm173_vm14, %v799_v61 }
 0x157   :  { %v673_v28 = vpop.f32.mrb[0].mxu0 }
 0x158   :  { %480 = vst [vmem:[#allocation2 + $0x8] sm:$0xff] %v673_v28  ;;  %v320_v29 = vpop.f32.mrb[1].mxu0 }
 0x159   :  { %479 = vst [vmem:[#allocation2] sm:$0xff] %v320_v29 }
 0x15b   :  { %v697_v30 = vpop.f32.mrb[0].mxu1 }
 0x15c   :  { %496 = vst [vmem:[#allocation2 + $0x88] sm:$0xff] %v697_v30  ;;  %v400_v31 = vpop.f32.mrb[1].mxu1 }
 0x15d   :  { %495 = vst [vmem:[#allocation2 + $0x80] sm:$0xff] %v400_v31 }
 0x162   :  { %v676_v32 = vpop.f32.mrb[2].mxu0  ;;  %v700_v33 = vpop.f32.mrb[2].mxu1 }
 0x163   :  { %482 = vst [vmem:[#allocation2 + $0x18] sm:$0xff] %v676_v32  ;;  %498 = vst [vmem:[#allocation2 + $0x98] sm:$0xff] %v700_v33  ;;  %v330_v34 = vpop.f32.mrb[3].mxu0  ;;  %v410_v35 = vpop.f32.mrb[3].mxu1 }
 0x164   :  { %481 = vst [vmem:[#allocation2 + $0x10] sm:$0xff] %v330_v34  ;;  %497 = vst [vmem:[#allocation2 + $0x90] sm:$0xff] %v410_v35 }
 0x16a   :  { %v679_v36 = vpop.f32.mrb[4].mxu0  ;;  %v703_v37 = vpop.f32.mrb[4].mxu1 }
 0x16b   :  { %484 = vst [vmem:[#allocation2 + $0x28] sm:$0xff] %v679_v36  ;;  %500 = vst [vmem:[#allocation2 + $0xa8] sm:$0xff] %v703_v37  ;;  %v340_v38 = vpop.f32.mrb[5].mxu0  ;;  %v420_v39 = vpop.f32.mrb[5].mxu1 }
 0x16c   :  { %483 = vst [vmem:[#allocation2 + $0x20] sm:$0xff] %v340_v38  ;;  %499 = vst [vmem:[#allocation2 + $0xa0] sm:$0xff] %v420_v39 }
 0x172   :  { %v682_v40 = vpop.f32.mrb[6].mxu0  ;;  %v706_v41 = vpop.f32.mrb[6].mxu1 }
 0x173   :  { %486 = vst [vmem:[#allocation2 + $0x38] sm:$0xff] %v682_v40  ;;  %502 = vst [vmem:[#allocation2 + $0xb8] sm:$0xff] %v706_v41  ;;  %v350_v42 = vpop.f32.mrb[7].mxu0  ;;  %v430_v43 = vpop.f32.mrb[7].mxu1 }
 0x174   :  { %485 = vst [vmem:[#allocation2 + $0x30] sm:$0xff] %v350_v42  ;;  %501 = vst [vmem:[#allocation2 + $0xb0] sm:$0xff] %v430_v43 }
 0x17a   :  { %v685_v44 = vpop.f32.mrb[8].mxu0  ;;  %v709_v45 = vpop.f32.mrb[8].mxu1 }
 0x17b   :  { %488 = vst [vmem:[#allocation2 + $0x48] sm:$0xff] %v685_v44  ;;  %504 = vst [vmem:[#allocation2 + $0xc8] sm:$0xff] %v709_v45  ;;  %v360_v46 = vpop.f32.mrb[9].mxu0  ;;  %v440_v47 = vpop.f32.mrb[9].mxu1 }
 0x17c   :  { %487 = vst [vmem:[#allocation2 + $0x40] sm:$0xff] %v360_v46  ;;  %503 = vst [vmem:[#allocation2 + $0xc0] sm:$0xff] %v440_v47 }
 0x182   :  { %v688_v48 = vpop.f32.mrb[10].mxu0  ;;  %v712_v49 = vpop.f32.mrb[10].mxu1 }
 0x183   :  { %490 = vst [vmem:[#allocation2 + $0x58] sm:$0xff] %v688_v48  ;;  %506 = vst [vmem:[#allocation2 + $0xd8] sm:$0xff] %v712_v49  ;;  %v370_v50 = vpop.f32.mrb[11].mxu0  ;;  %v450_v51 = vpop.f32.mrb[11].mxu1 }
 0x184   :  { %489 = vst [vmem:[#allocation2 + $0x50] sm:$0xff] %v370_v50  ;;  %505 = vst [vmem:[#allocation2 + $0xd0] sm:$0xff] %v450_v51 }
 0x18a   :  { %v691_v52 = vpop.f32.mrb[12].mxu0  ;;  %v715_v53 = vpop.f32.mrb[12].mxu1 }
 0x18b   :  { %492 = vst [vmem:[#allocation2 + $0x68] sm:$0xff] %v691_v52  ;;  %508 = vst [vmem:[#allocation2 + $0xe8] sm:$0xff] %v715_v53  ;;  %v380_v54 = vpop.f32.mrb[13].mxu0  ;;  %v460_v55 = vpop.f32.mrb[13].mxu1 }
 0x18c   :  { %491 = vst [vmem:[#allocation2 + $0x60] sm:$0xff] %v380_v54  ;;  %507 = vst [vmem:[#allocation2 + $0xe0] sm:$0xff] %v460_v55 }
 0x192   :  { %v694_v56 = vpop.f32.mrb[14].mxu0  ;;  %v718_v57 = vpop.f32.mrb[14].mxu1 }
 0x193   :  { %494 = vst [vmem:[#allocation2 + $0x78] sm:$0xff] %v694_v56  ;;  %510 = vst [vmem:[#allocation2 + $0xf8] sm:$0xff] %v718_v57  ;;  %v390_v58 = vpop.f32.mrb[15].mxu0  ;;  %v470_v59 = vpop.f32.mrb[15].mxu1 }
 0x194   :  { %493 = vst [vmem:[#allocation2 + $0x70] sm:$0xff] %v390_v58  ;;  %509 = vst [vmem:[#allocation2 + $0xf0] sm:$0xff] %v470_v59 }
 0x195   :  { %785 = shalt.err (!%p782_p4)
}
 0x196   :  { %s786_s24 = scalar_lea.hbm %s1042_s2, 4096 }
 0x197   :  { %p787_p5 = scmp.ne.s32.totalorder %s1042_s2, %s786_s24  ;;  %p790_p6 = scmp.lt.u32.totalorder %s786_s24, %s1042_s2 }
 0x199   :  { %p792_p7 = pnand %p790_p6, %p787_p5 }
 0x19b   :  { %795 = shalt.err (!%p792_p7)
}
 0x19c   :  { %s801_s28 = smov 128   ;;  %s802_s29 = smov 8  }
 0x19d   :  { %522 = dma.vmem_to_hbm [thread:$0]  %s517_s20, 4096, %s1042_s2, [#allocation3], %s801_s28, %s801_s28, %s802_s29  }
 0x19e   :  { %796 = dma.done.wait [#allocation3], 4096  }
 0x19f   :  { %797 = vsyncadd [#allocation3], 4294963200 }
 0x1a0   :  { %526 = vsyncpa [#allocation3], 1 }

</bundles_post_ra>
